<compile_context>
chip_gen: v6e
topology: v6e:2x2x1
jax: 0.10.0
libtpu: 0.0.40
codegen_flags: <defaults>
</compile_context>

<pallas_src>
import functools
import math

import jax
import jax.numpy as jnp
from jax.experimental import pallas as pl
from jax.experimental.pallas import tpu as pltpu

LANE = 128                          # lane (last-dim) tiling
DEFAULT_MXU_DTYPE = jnp.bfloat16    # MXU-native on v5e/v6e/v7x; accumulation stays f32


def _round_up(x, m):
    return (x + m - 1) // m * m


def _vmem_limit_bytes(n_bytes):
    """Explicit scoped-VMEM budget: 2x headroom, floor 32 MiB, cap 64 MiB (v7x physical)."""
    return int(min(max(2 * n_bytes, 32 * 2**20), 64 * 2**20))


# ----------------------------------------------------------------------------
# Kernel 1: fused MLP — all layers in one kernel, intermediates stay on-chip
# ----------------------------------------------------------------------------
def _fused_mlp_kernel(*refs, n_layers, semantic_layer_idx, dual_out, mxu_dtype):
    x_ref = refs[0]
    w_refs = refs[1:1 + n_layers]
    b_refs = refs[1 + n_layers:1 + 2 * n_layers]
    out_refs = refs[1 + 2 * n_layers:]

    h = x_ref[...].astype(mxu_dtype)                   # MXU operand dtype
    a = None
    for i in range(n_layers):                          # static unroll over layers
        z = jnp.dot(h, w_refs[i][...],
                    preferred_element_type=jnp.float32) + b_refs[i][...]
        if i == n_layers - 1:
            a = jnp.tanh(z)                            # final Tanh (EUP slot)
        else:
            a = jnp.where(z >= 0.0, z, 0.01 * z)       # LeakyReLU (PyTorch slope)
        if dual_out and i == semantic_layer_idx:
            out_refs[1][...] = a                       # semantic activation (f32)
        h = a.astype(mxu_dtype)                        # next MXU operand
    out_refs[0][...] = a                               # Y_tilde (f32)


def fused_mlp(x_pad, ws, bs, semantic_layer_idx, dual_out, tile_m,
              p_last, p_sem, mxu_dtype):
    batch_pad, input_dim = x_pad.shape
    n_layers = len(ws)
    grid = (batch_pad // tile_m,)

    in_specs = [pl.BlockSpec((tile_m, input_dim), lambda i: (i, 0))]   # x tile
    for arr in list(ws) + list(bs):                    # resident per-layer W / b
        in_specs.append(pl.BlockSpec(arr.shape, lambda i: (0, 0)))

    out_shape = [jax.ShapeDtypeStruct((batch_pad, p_last), jnp.float32)]
    out_specs = [pl.BlockSpec((tile_m, p_last), lambda i: (i, 0))]     # Y_tilde
    if dual_out:
        out_shape.append(jax.ShapeDtypeStruct((batch_pad, p_sem), jnp.float32))
        out_specs.append(pl.BlockSpec((tile_m, p_sem), lambda i: (i, 0)))  # semantic_H

    weight_bytes = sum(int(a.size) * a.dtype.itemsize for a in list(ws) + list(bs))
    out_bytes = sum(tile_m * s.shape[1] * 4 for s in out_shape)
    act_bytes = 2 * tile_m * max(w.shape[1] for w in ws) * 4
    needed = 2 * (weight_bytes + tile_m * input_dim * 4 + out_bytes) + act_bytes

    kernel = functools.partial(
        _fused_mlp_kernel, n_layers=n_layers,
        semantic_layer_idx=semantic_layer_idx, dual_out=dual_out,
        mxu_dtype=mxu_dtype)
    # TODO(synk): pipeline_mode=pl.Buffered(1) on the constant-index weight blocks
    # would halve their VMEM residency once confirmed supported by this JAX version.
    return pl.pallas_call(
        kernel,
        out_shape=tuple(out_shape),
        grid=grid,
        in_specs=in_specs,
        out_specs=tuple(out_specs),
        compiler_params=pltpu.CompilerParams(
            dimension_semantics=("parallel",),
            vmem_limit_bytes=_vmem_limit_bytes(needed)),
    )(x_pad, *ws, *bs)


# ----------------------------------------------------------------------------
# Kernel 2: both orthonormalization matmuls fused, outputs alias inputs
# ----------------------------------------------------------------------------
def _ortho_kernel(*refs, dual_in, mxu_dtype):
    if dual_in:
        y1_ref, w1_ref, y2_ref, w2_ref, o1_ref, o2_ref = refs
    else:
        y1_ref, w1_ref, w2_ref, o1_ref, o2_ref = refs
        y2_ref = None
    y1 = y1_ref[...].astype(mxu_dtype)
    o1_ref[...] = jnp.dot(y1, w1_ref[...], preferred_element_type=jnp.float32)
    y2 = y2_ref[...].astype(mxu_dtype) if dual_in else y1
    o2_ref[...] = jnp.dot(y2, w2_ref[...], preferred_element_type=jnp.float32)


def ortho_matmuls(y1_pad, w1_pad, y2_pad, w2_pad, tile_m, dual_in, mxu_dtype):
    batch_pad, p1 = y1_pad.shape
    p2 = w2_pad.shape[1]
    grid = (batch_pad // tile_m,)

    if dual_in:
        operands = (y1_pad, w1_pad, y2_pad, w2_pad)
        in_specs = [pl.BlockSpec((tile_m, p1), lambda i: (i, 0)),
                    pl.BlockSpec(w1_pad.shape, lambda i: (0, 0)),
                    pl.BlockSpec((tile_m, p2), lambda i: (i, 0)),
                    pl.BlockSpec(w2_pad.shape, lambda i: (0, 0))]
        aliases = {0: 0, 2: 1}        # Y_tilde_pad -> Y_pad, H_pad -> ortho_H_pad
    else:                             # Y_tilde == semantic_H (dedup case)
        operands = (y1_pad, w1_pad, w2_pad)
        in_specs = [pl.BlockSpec((tile_m, p1), lambda i: (i, 0)),
                    pl.BlockSpec(w1_pad.shape, lambda i: (0, 0)),
                    pl.BlockSpec(w2_pad.shape, lambda i: (0, 0))]
        aliases = {0: 0}

    out_shape = (jax.ShapeDtypeStruct((batch_pad, p1), jnp.float32),
                 jax.ShapeDtypeStruct((batch_pad, p2), jnp.float32))
    out_specs = (pl.BlockSpec((tile_m, p1), lambda i: (i, 0)),
                 pl.BlockSpec((tile_m, p2), lambda i: (i, 0)))

    weight_bytes = sum(int(a.size) * a.dtype.itemsize for a in (w1_pad, w2_pad))
    io_bytes = tile_m * (2 * p1 + 2 * p2) * 4
    needed = 2 * (weight_bytes + io_bytes)

    kernel = functools.partial(_ortho_kernel, dual_in=dual_in, mxu_dtype=mxu_dtype)
    return pl.pallas_call(
        kernel,
        out_shape=out_shape,
        grid=grid,
        in_specs=in_specs,
        out_specs=out_specs,
        input_output_aliases=aliases,
        compiler_params=pltpu.CompilerParams(
            dimension_semantics=("parallel",),
            vmem_limit_bytes=_vmem_limit_bytes(needed)),
    )(*operands)


# ----------------------------------------------------------------------------
# SpectralNetModel in JAX (forward semantics match the PyTorch module)
# ----------------------------------------------------------------------------
def init_params(key, architecture, input_dim):
    """nn.Linear-style init (uniform +/- 1/sqrt(fan_in)); W stored (in, out)."""
    params = []
    current_dim = input_dim
    for out_dim in architecture:
        key, kw, kb = jax.random.split(key, 3)
        bound = 1.0 / math.sqrt(current_dim)
        w = jax.random.uniform(kw, (current_dim, out_dim), jnp.float32, -bound, bound)
        b = jax.random.uniform(kb, (out_dim,), jnp.float32, -bound, bound)
        params.append((w, b))
        current_dim = out_dim
    return params


def pack_params(params, mxu_dtype):
    """Per-layer padding only: W_i -> (prev-padded in, round_up(out_i, 128)).

    Padded weight rows/cols and bias lanes are zero, so padded activation
    columns remain exactly zero through every layer.
    """
    ws, bs = [], []
    for i, (w, b) in enumerate(params):
        in_dim, out_dim = w.shape
        in_pad = in_dim if i == 0 else _round_up(in_dim, LANE)
        out_pad = _round_up(out_dim, LANE)
        ws.append(jnp.pad(w, ((0, in_pad - in_dim),
                              (0, out_pad - out_dim))).astype(mxu_dtype))
        bs.append(jnp.pad(b, (0, out_pad - out_dim)).reshape(1, out_pad)
                  .astype(jnp.float32))
    return ws, bs


def orthonormalize(y):
    """w = sqrt(m) * inv(R), (_, R) = qr(y), via triangular solve.

    Requires batch >= width (square reduced-QR R) — same implicit constraint
    as torch.inverse(L) in the PyTorch module.  Rank-deficient y gives
    inf/NaN, exactly like the original.
    """
    m, n = y.shape
    assert m >= n, "orthonormalize requires batch >= feature width"
    _, r = jnp.linalg.qr(y)
    eye = jnp.eye(n, dtype=y.dtype)
    return jnp.sqrt(jnp.float32(m)) * jax.scipy.linalg.solve_triangular(r, eye)


def _tiling(batch):
    """Bounded (<256 extra rows) batch padding; >=2 grid steps; 256-row tiles when big."""
    if batch > 256:
        tile_m = 256                                     # fills v6e/v7x 256x256 MXU rows
        batch_pad = _round_up(batch, tile_m)
    else:
        tile_m = 128
        batch_pad = max(_round_up(batch, tile_m), 2 * tile_m)   # 2 steps for v7x's 2 TCs
    return tile_m, batch_pad


def spectralnet_forward(params, architecture, x, semantic_out_dim,
                        should_update_orth_weights=True, orth_weights=None,
                        mxu_dtype=DEFAULT_MXU_DTYPE):
    n_layers = len(architecture)
    matches = [i for i, d in enumerate(architecture) if d == semantic_out_dim]
    assert matches, "no layer width matches semantic_out_dim"
    semantic_layer_idx = matches[-1]                 # PyTorch keeps the last match
    dual_out = semantic_layer_idx != n_layers - 1    # last layer -> Y_tilde == semantic_H

    batch, input_dim = x.shape
    n_last = architecture[-1]
    p_last = _round_up(n_last, LANE)
    p_sem = _round_up(semantic_out_dim, LANE)

    tile_m, batch_pad = _tiling(batch)
    x_f32 = x.astype(jnp.float32)
    x_pad = (x_f32 if batch_pad == batch
             else jnp.pad(x_f32, ((0, batch_pad - batch), (0, 0))))   # batch pad only

    ws, bs = pack_params(params, mxu_dtype)
    outs = fused_mlp(x_pad, ws, bs, semantic_layer_idx, dual_out, tile_m,
                     p_last, p_sem, mxu_dtype)
    if dual_out:
        y_tilde_pad, h_pad = outs
    else:
        y_tilde_pad = outs[0]
        h_pad = y_tilde_pad

    y_tilde = y_tilde_pad[:batch, :n_last]
    semantic_h = h_pad[:batch, :semantic_out_dim]

    if should_update_orth_weights:
        orth_w = orthonormalize(y_tilde)
        orth_w2 = orthonormalize(semantic_h)
    else:
        # Reuse previously computed orthonormalization weights (PyTorch caches them on self).
        assert orth_weights is not None, "pass orth_weights=(W, W2) when not updating"
        orth_w, orth_w2 = orth_weights

    orth_w_pad = jnp.pad(orth_w, ((0, p_last - n_last),
                                  (0, p_last - n_last))).astype(mxu_dtype)
    orth_w2_pad = jnp.pad(orth_w2, ((0, p_sem - semantic_out_dim),
                                    (0, p_sem - semantic_out_dim))).astype(mxu_dtype)

    y_pad, ortho_h_pad = ortho_matmuls(
        y_tilde_pad, orth_w_pad, h_pad if dual_out else None, orth_w2_pad,
        tile_m, dual_in=dual_out, mxu_dtype=mxu_dtype)

    y = y_pad[:batch, :n_last]
    ortho_h = ortho_h_pad[:batch, :semantic_out_dim]
    return y, semantic_h, ortho_h


# ----------------------------------------------------------------------------
# Pure-JAX reference using the same precision recipe (bf16 operands, f32 acc)
# ----------------------------------------------------------------------------
def reference_forward(params, architecture, x, semantic_out_dim,
                      mxu_dtype=DEFAULT_MXU_DTYPE):
    def mm(a, b):
        return jax.lax.dot(a.astype(mxu_dtype), b.astype(mxu_dtype),
                           preferred_element_type=jnp.float32)

    n_layers = len(params)
    h = x.astype(jnp.float32)
    semantic_h = None
    for i, (w, b) in enumerate(params):
        z = mm(h, w) + b
        h = jnp.tanh(z) if i == n_layers - 1 else jnp.where(z >= 0, z, 0.01 * z)
        if architecture[i] == semantic_out_dim:
            semantic_h = h
    orth_w = orthonormalize(h)
    orth_w2 = orthonormalize(semantic_h)
    return mm(h, orth_w), semantic_h, mm(semantic_h, orth_w2)


def _run_and_check(batch, input_dim, architecture, semantic_out_dim):
    key = jax.random.PRNGKey(0)
    key_x, key_p = jax.random.split(key)
    x = jax.random.normal(key_x, (batch, input_dim), jnp.float32)
    params = init_params(key_p, architecture, input_dim)

    y, semantic_h, ortho_h = spectralnet_forward(
        params, architecture, x, semantic_out_dim,
        should_update_orth_weights=True)
    jax.block_until_ready((y, semantic_h, ortho_h))

    y_ref, sh_ref, oh_ref = reference_forward(params, architecture, x,
                                              semantic_out_dim)
    assert y.shape == (batch, architecture[-1])
    assert semantic_h.shape == (batch, semantic_out_dim)
    assert ortho_h.shape == (batch, semantic_out_dim)
    assert jnp.allclose(semantic_h, sh_ref, atol=1e-3, rtol=1e-3), "semantic_H mismatch"
    assert jnp.allclose(y, y_ref, atol=2e-2, rtol=2e-2), "Y mismatch"
    assert jnp.allclose(ortho_h, oh_ref, atol=2e-2, rtol=2e-2), "ortho_H mismatch"


if __name__ == "__main__":
    # Small shapes; batch >= every QR width (same constraint as the PyTorch code).
    # Case 1: semantic layer in the middle (two kernel-1 outputs).
    _run_and_check(batch=64, input_dim=16, architecture=[32, 16, 8],
                   semantic_out_dim=16)
    # Case 2: semantic layer == last layer (deduplicated single kernel-1 output).
    _run_and_check(batch=40, input_dim=12, architecture=[24, 16],
                   semantic_out_dim=16)
    print("KERNEL_OK")
</pallas_src>

<mosaic_0001>
module attributes {stable_mosaic.version = 11 : i64} {
  func.func @_fused_mlp_kernel(%arg0: i32, %arg1: memref<128x16xf32, #tpu.memory_space<vmem>>, %arg2: memref<16x128xbf16, #tpu.memory_space<vmem>>, %arg3: memref<128x128xbf16, #tpu.memory_space<vmem>>, %arg4: memref<128x128xbf16, #tpu.memory_space<vmem>>, %arg5: memref<1x128xf32, #tpu.memory_space<vmem>>, %arg6: memref<1x128xf32, #tpu.memory_space<vmem>>, %arg7: memref<1x128xf32, #tpu.memory_space<vmem>>, %arg8: memref<128x128xf32, #tpu.memory_space<vmem>>, %arg9: memref<128x128xf32, #tpu.memory_space<vmem>>) attributes {dimension_semantics = [#tpu.dimension_semantics<parallel>], iteration_bounds = array<i64: 2>, scalar_prefetch = 0 : i64, scratch_operands = 0 : i64, tpu.core_type = #tpu.core_type<tc>, window_params = [{transform_indices = @transform_0, window_bounds = array<i64: 128, 16>}, {pipeline_mode = #tpu.pipeline_mode<synchronous>, transform_indices = @transform_1, window_bounds = array<i64: 16, 128>}, {pipeline_mode = #tpu.pipeline_mode<synchronous>, transform_indices = @transform_2, window_bounds = array<i64: 128, 128>}, {pipeline_mode = #tpu.pipeline_mode<synchronous>, transform_indices = @transform_3, window_bounds = array<i64: 128, 128>}, {pipeline_mode = #tpu.pipeline_mode<synchronous>, transform_indices = @transform_4, window_bounds = array<i64: 1, 128>}, {pipeline_mode = #tpu.pipeline_mode<synchronous>, transform_indices = @transform_5, window_bounds = array<i64: 1, 128>}, {pipeline_mode = #tpu.pipeline_mode<synchronous>, transform_indices = @transform_6, window_bounds = array<i64: 1, 128>}, {transform_indices = @transform_7, window_bounds = array<i64: 128, 128>}, {transform_indices = @transform_8, window_bounds = array<i64: 128, 128>}]} {
    %c0 = arith.constant 0 : index
    %c0_0 = arith.constant 0 : index
    %0 = vector.load %arg1[%c0, %c0_0] : memref<128x16xf32, #tpu.memory_space<vmem>>, vector<128x16xf32>
    %1 = arith.truncf %0 : vector<128x16xf32> to vector<128x16xbf16>
    %c0_1 = arith.constant 0 : index
    %c0_2 = arith.constant 0 : index
    %2 = vector.load %arg2[%c0_1, %c0_2] : memref<16x128xbf16, #tpu.memory_space<vmem>>, vector<16x128xbf16>
    %cst = arith.constant dense<0.000000e+00> : vector<128x128xf32>
    %3 = tpu.matmul %1, %2, %cst {dimension_numbers = #tpu.dot_dimension_numbers<[1], [0], [0], [1], [0, 0, 1, 1], [], []>} : vector<128x16xbf16>, vector<16x128xbf16>, vector<128x128xf32> -> vector<128x128xf32>
    %c0_3 = arith.constant 0 : index
    %c0_4 = arith.constant 0 : index
    %4 = vector.load %arg5[%c0_3, %c0_4] : memref<1x128xf32, #tpu.memory_space<vmem>>, vector<1x128xf32>
    %5 = vector.broadcast %4 : vector<1x128xf32> to vector<128x128xf32>
    %6 = arith.addf %3, %5 : vector<128x128xf32>
    %cst_5 = arith.constant 0.000000e+00 : f32
    %7 = vector.broadcast %cst_5 : f32 to vector<128x128xf32>
    %8 = arith.cmpf oge, %6, %7 : vector<128x128xf32>
    %cst_6 = arith.constant 0.00999999977 : f32
    %9 = vector.broadcast %cst_6 : f32 to vector<128x128xf32>
    %10 = arith.mulf %9, %6 : vector<128x128xf32>
    %11 = arith.select %8, %6, %10 : vector<128x128xi1>, vector<128x128xf32>
    %12 = arith.truncf %11 : vector<128x128xf32> to vector<128x128xbf16>
    %c0_7 = arith.constant 0 : index
    %c0_8 = arith.constant 0 : index
    %13 = vector.load %arg3[%c0_7, %c0_8] : memref<128x128xbf16, #tpu.memory_space<vmem>>, vector<128x128xbf16>
    %cst_9 = arith.constant dense<0.000000e+00> : vector<128x128xf32>
    %14 = tpu.matmul %12, %13, %cst_9 {dimension_numbers = #tpu.dot_dimension_numbers<[1], [0], [0], [1], [0, 0, 1, 1], [], []>} : vector<128x128xbf16>, vector<128x128xbf16>, vector<128x128xf32> -> vector<128x128xf32>
    %c0_10 = arith.constant 0 : index
    %c0_11 = arith.constant 0 : index
    %15 = vector.load %arg6[%c0_10, %c0_11] : memref<1x128xf32, #tpu.memory_space<vmem>>, vector<1x128xf32>
    %16 = vector.broadcast %15 : vector<1x128xf32> to vector<128x128xf32>
    %17 = arith.addf %14, %16 : vector<128x128xf32>
    %cst_12 = arith.constant 0.000000e+00 : f32
    %18 = vector.broadcast %cst_12 : f32 to vector<128x128xf32>
    %19 = arith.cmpf oge, %17, %18 : vector<128x128xf32>
    %cst_13 = arith.constant 0.00999999977 : f32
    %20 = vector.broadcast %cst_13 : f32 to vector<128x128xf32>
    %21 = arith.mulf %20, %17 : vector<128x128xf32>
    %22 = arith.select %19, %17, %21 : vector<128x128xi1>, vector<128x128xf32>
    %c0_14 = arith.constant 0 : index
    %c0_15 = arith.constant 0 : index
    %23 = vector.load %arg9[%c0_14, %c0_15] : memref<128x128xf32, #tpu.memory_space<vmem>>, vector<128x128xf32>
    tpu.vector_store %arg9[%c0_14, %c0_15], %22 {strides = array<i32>} : memref<128x128xf32, #tpu.memory_space<vmem>>, vector<128x128xf32>,
    %24 = arith.truncf %22 : vector<128x128xf32> to vector<128x128xbf16>
    %c0_16 = arith.constant 0 : index
    %c0_17 = arith.constant 0 : index
    %25 = vector.load %arg4[%c0_16, %c0_17] : memref<128x128xbf16, #tpu.memory_space<vmem>>, vector<128x128xbf16>
    %cst_18 = arith.constant dense<0.000000e+00> : vector<128x128xf32>
    %26 = tpu.matmul %24, %25, %cst_18 {dimension_numbers = #tpu.dot_dimension_numbers<[1], [0], [0], [1], [0, 0, 1, 1], [], []>} : vector<128x128xbf16>, vector<128x128xbf16>, vector<128x128xf32> -> vector<128x128xf32>
    %c0_19 = arith.constant 0 : index
    %c0_20 = arith.constant 0 : index
    %27 = vector.load %arg7[%c0_19, %c0_20] : memref<1x128xf32, #tpu.memory_space<vmem>>, vector<1x128xf32>
    %28 = vector.broadcast %27 : vector<1x128xf32> to vector<128x128xf32>
    %29 = arith.addf %26, %28 : vector<128x128xf32>
    %30 = math.tanh %29 : vector<128x128xf32>
    %c0_21 = arith.constant 0 : index
    %c0_22 = arith.constant 0 : index
    %31 = vector.load %arg8[%c0_21, %c0_22] : memref<128x128xf32, #tpu.memory_space<vmem>>, vector<128x128xf32>
    tpu.vector_store %arg8[%c0_21, %c0_22], %30 {strides = array<i32>} : memref<128x128xf32, #tpu.memory_space<vmem>>, vector<128x128xf32>,
    return
  }
  func.func @transform_0(%arg0: i32) -> (i32, i32) {
    %c0_i32 = arith.constant 0 : i32
    %c0_i32_0 = arith.constant 0 : i32
    return %arg0, %c0_i32 : i32, i32
  }
  func.func @transform_1(%arg0: i32) -> (i32, i32) {
    %c0_i32 = arith.constant 0 : i32
    %c0_i32_0 = arith.constant 0 : i32
    %c0_i32_1 = arith.constant 0 : i32
    return %c0_i32, %c0_i32_0 : i32, i32
  }
  func.func @transform_2(%arg0: i32) -> (i32, i32) {
    %c0_i32 = arith.constant 0 : i32
    %c0_i32_0 = arith.constant 0 : i32
    %c0_i32_1 = arith.constant 0 : i32
    return %c0_i32, %c0_i32_0 : i32, i32
  }
  func.func @transform_3(%arg0: i32) -> (i32, i32) {
    %c0_i32 = arith.constant 0 : i32
    %c0_i32_0 = arith.constant 0 : i32
    %c0_i32_1 = arith.constant 0 : i32
    return %c0_i32, %c0_i32_0 : i32, i32
  }
  func.func @transform_4(%arg0: i32) -> (i32, i32) {
    %c0_i32 = arith.constant 0 : i32
    %c0_i32_0 = arith.constant 0 : i32
    %c0_i32_1 = arith.constant 0 : i32
    return %c0_i32, %c0_i32_0 : i32, i32
  }
  func.func @transform_5(%arg0: i32) -> (i32, i32) {
    %c0_i32 = arith.constant 0 : i32
    %c0_i32_0 = arith.constant 0 : i32
    %c0_i32_1 = arith.constant 0 : i32
    return %c0_i32, %c0_i32_0 : i32, i32
  }
  func.func @transform_6(%arg0: i32) -> (i32, i32) {
    %c0_i32 = arith.constant 0 : i32
    %c0_i32_0 = arith.constant 0 : i32
    %c0_i32_1 = arith.constant 0 : i32
    return %c0_i32, %c0_i32_0 : i32, i32
  }
  func.func @transform_7(%arg0: i32) -> (i32, i32) {
    %c0_i32 = arith.constant 0 : i32
    %c0_i32_0 = arith.constant 0 : i32
    return %arg0, %c0_i32 : i32, i32
  }
  func.func @transform_8(%arg0: i32) -> (i32, i32) {
    %c0_i32 = arith.constant 0 : i32
    %c0_i32_0 = arith.constant 0 : i32
    return %arg0, %c0_i32 : i32, i32
  }
}

</mosaic_0001>

<bundles_post_ra>
// kernel: tpu_custom_call.1
= control target key start
LH: loop header
LB: loop body
LE: loop exit
PB: predicated region body
PF: predicated region fallthrough
CT: control target
= control target key end

     0   :  { %14 = vsyncpa [#allocation3], 0  ;;  %s1835_s0 = inlined_call_operand.vmem [shape: f32[256,16], index: 0, kind: input, shape index: {}]   ;;  %s1836_s1 = inlined_call_operand.vmem [shape: bf16[16,128], index: 1, kind: input, shape index: {}]   ;;  %s1837_s2 = inlined_call_operand.vmem [shape: bf16[128,128], index: 2, kind: input, shape index: {}]   ;;  %s1838_s3 = inlined_call_operand.vmem [shape: bf16[128,128], index: 3, kind: input, shape index: {}]   ;;  %s1839_s4 = inlined_call_operand.vmem [shape: f32[1,128], index: 4, kind: input, shape index: {}]   ;;  %s1840_s5 = inlined_call_operand.vmem [shape: f32[1,128], index: 5, kind: input, shape index: {}]   ;;  %s1841_s6 = inlined_call_operand.vmem [shape: f32[1,128], index: 6, kind: input, shape index: {}]   ;;  %s1842_s7 = inlined_call_operand.hbm [shape: f32[256,128], index: 7, kind: output, shape index: {0}]   ;;  %s1843_s8 = inlined_call_operand.hbm [shape: f32[256,128], index: 8, kind: output, shape index: {1}]  }
   0x1   :  { %16 = vsyncpa [#allocation3 + $0x1], 0 }
   0x2   :  { %17 = vsyncpa [#allocation5], 0 }
   0x3   :  { %19 = vsyncpa [#allocation5 + $0x1], 0  ;;  %s1511_s27 = smov 0   ;;  %s1513_s28 = smov 0  }
   0x4   :  { %s1515_s29 = smov 0   ;;  %s1517_s30 = smov 0  }
   0x5 LB: > { %s1532_s9 = sadd.s32 4294967295, %s1460_s30   ;;  %s1106_s10 = sadd.s32 4294967294, %s1460_s30   ;;  %s1460_s30 = sphi %s1517_s30, %s1853_s30   ;;  %s1456_s29 = sphi %s1515_s29, %s1852_s29   ;;  %s1452_s28 = sphi %s1513_s28, %s1851_s28   ;;  %s1448_s27 = sphi %s1511_s27, %s1850_s27  }
   0x6   : > { %s1536_s11 = sadd.s32 1, %s1460_s30   ;;  %s184_s12 = sadd.s32 1, %s1456_s29 }
   0x7   : > { %s181_s13 = ssub.s32 %s1460_s30, %s1536_s11  ;;  %p194_p0 = scmp.ne.s32.totalorder %s1456_s29, %s1452_s28 }
   0x8   : > { %p182_p1 = scmp.eq.s32.totalorder %s181_s13, 0  ;;  %p195_p2 = scmp.eq.s32.totalorder %s1532_s9, 1 }
   0x9   : > { %p200_p3 = scmp.ne.s32.totalorder %s1452_s28, %s1448_s27  ;;  %p201_p4 = scmp.eq.s32.totalorder %s1106_s10, 1 }
   0xa   : > { %s1547_s14 = scalar_select %p182_p1, %s1456_s29, %s184_s12  }
   0xb   : > { %p1549_p5 = por %p195_p2, %p194_p0  ;;  %p1553_p6 = por %p201_p4, %p200_p3 }
   0xc   : > { %p1109_p7 = scmp.ge.s32.totalorder %s1460_s30, 1  ;;  %p272_p8 = scmp.lt.s32.totalorder %s1460_s30, 3 }
   0xe   : > { %p273_p9 = pnand %p1109_p7, %p272_p8 }
   0xf   : > { %s1112_s19 = sshll.u32 (!%p273_p9), %s1532_s9, 4  ;;  %s1462_s18 = smov (!%p273_p9), [#allocation4]  }
  0x10   : > { %276 = sbr.rel (%p273_p9) target bundleno = 694 (0x2b6), region = 48  ;;  %p312_p10 = scmp.lt.s32.totalorder (!%p273_p9), %s1112_s19, 31 }
  0x11   : > { %s1374_s20 = sshll.u32 (!%p273_p9), %s1462_s18, 4  ;;  %s1375_s20 = int_to_ptr.vmem [resolvable:$false] %s1374_s20 }
  0x12   : > { %s1376_s21 = scalar_lea.vmem (!%p273_p9), %s1375_s20, 4096 }
  0x15   : > { %v1321_v0 = vld [vmem:[%s1836_s1] sm:$0xff]   ;;  %v1322_v1 = vld [vmem:[%s1837_s2 + $0x38] sm:$0xff]   ;;  %s1855_s19 = smov (!%p312_p10, %s1112_s19), 31  ;;  %v1323_v2 = vld [vmem:[%s1837_s2 + $0x30] sm:$0xff]   ;;  %vm359_vm0 = vcmask 130048  }
  0x16   : > { %1193 = vmatprep.subr.bf16.mxu0 %v1321_v0  ;;  %1211 = vmatprep.subr.bf16.mxu1 %v1322_v1  ;;  %s1113_s24 = sshll.u32 %s1855_s19, 3  ;;  %v1324_v3 = vld [vmem:[%s1837_s2 + $0x28] sm:$0xff]   ;;  %v1325_v13 = vld [vmem:[%s1837_s2 + $0x20] sm:$0xff]   ;;  %v1326_v18 = vld [vmem:[%s1837_s2 + $0x18] sm:$0xff]   ;;  %s1662_s19 = sand.u32 1, %s1452_s28  }
  0x17   : > { %1194 = vmatpush3.bf16.msra.mxu0 %v1321_v0  ;;  %1212 = vmatpush3.bf16.msra.mxu1 %v1322_v1  ;;  %s1572_s10 = scalar_lea.vmem %s1835_s0, %s1113_s24  ;;  %v1327_v30 = vld [vmem:[%s1837_s2 + $0x10] sm:$0xff]   ;;  %v1328_v31 = vld [vmem:[%s1837_s2 + $0x8] sm:$0xff]   ;;  %v1329_v32 = vld [vmem:[%s1837_s2] sm:$0xff]   ;;  %s1845_s22 = sshll.u32 %s1662_s19, 7 }
  0x18   : > { %1213 = vmatprep.subr.bf16.mxu1 %v1323_v2  ;;  %v320_v4 = vld [vmem:[%s1572_s10] sm:$0xff]  ;;  %v321_v5 = vld [vmem:[%s1572_s10 + $0x8] sm:$0xff]  ;;  %v322_v6 = vld [vmem:[%s1572_s10 + $0x10] sm:$0xff]  ;;  %s1675_s23 = scalar_lea.vmem [#allocation4], %s1845_s22  ;;  %s1844_s24 = sshll.u32 %s1532_s9, 11 }
  0x19   : > { %v336_v7 = vpack.c.bf16 %v321_v5, %v320_v4  ;;  %v323_v8 = vld [vmem:[%s1572_s10 + $0x18] sm:$0xff]  ;;  %v324_v9 = vld [vmem:[%s1572_s10 + $0x20] sm:$0xff]  ;;  %v325_v10 = vld [vmem:[%s1572_s10 + $0x28] sm:$0xff]  ;;  %s1012_s12 = sshll.u32 %s1675_s23, 4  ;;  %s983_s13 = scalar_lea.sflag [#allocation5], %s1662_s19  ;;  %s1715_s12 = int_to_ptr.vmem [resolvable:$true] %s1012_s12 }
  0x1a   : > { %v337_v11 = vpack.c.bf16 %v323_v8, %v322_v6  ;;  %v338_v12 = vpack.c.bf16 %v325_v10, %v324_v9  ;;  %v326_v14 = vld [vmem:[%s1572_s10 + $0x30] sm:$0xff]  ;;  %v327_v15 = vld [vmem:[%s1572_s10 + $0x38] sm:$0xff]  ;;  %v328_v16 = vld [vmem:[%s1572_s10 + $0x40] sm:$0xff]  ;;  %s1370_s17 = scalar_lea.vmem %s1715_s12, 2048  ;;  %p1377_p0 = scmp.lt.s32.totalorder %s1715_s12, %s1375_s20 }
  0x1b   : > { %1214 = vmatpush3.bf16.msra.mxu1 %v1323_v2  ;;  %1195 = vmatprep.mubr.msk.bf16.mxu0 %vm359_vm0, %v336_v7  ;;  %v329_v17 = vld [vmem:[%s1572_s10 + $0x48] sm:$0xff]  ;;  %v339_v19 = vpack.c.bf16 %v327_v15, %v326_v14  ;;  %v330_v21 = vld [vmem:[%s1572_s10 + $0x50] sm:$0xff]  ;;  %v331_v22 = vld [vmem:[%s1572_s10 + $0x58] sm:$0xff]  ;;  %p1371_p11 = scmp.ne.s32.totalorder %s1715_s12, %s1370_s17  ;;  %p1378_p1 = scmp.lt.s32.totalorder %s1376_s21, %s1370_s17 }
  0x1c   : > { %1215 = vmatprep.subr.bf16.mxu1 %v1324_v3  ;;  %1196 = vmatmul.mubr.msk.bf16.vlgmr.msra.gmra.mxu0 %vm359_vm0, %v337_v11  ;;  %v340_v20 = vpack.c.bf16 %v329_v17, %v328_v16  ;;  %v332_v23 = vld [vmem:[%s1572_s10 + $0x60] sm:$0xff]  ;;  %v333_v24 = vld [vmem:[%s1572_s10 + $0x68] sm:$0xff]  ;;  %v341_v25 = vpack.c.bf16 %v331_v22, %v330_v21  ;;  %v334_v27 = vld [vmem:[%s1572_s10 + $0x70] sm:$0xff] }
  0x1d   : > { %1199 = vmatprep.mubr.msk.bf16.mxu0 %vm359_vm0, %v338_v12  ;;  %v342_v26 = vpack.c.bf16 %v333_v24, %v332_v23  ;;  %v335_v28 = vld [vmem:[%s1572_s10 + $0x78] sm:$0xff]  ;;  %v1331_v34 = vld [vmem:[%s1838_s3 + $0x30] sm:$0xff]   ;;  %v1332_v35 = vld [vmem:[%s1838_s3 + $0x28] sm:$0xff]   ;;  %s1712_s10 = scalar_lea.hbm %s1843_s8, %s1844_s24  ;;  %p1372_p12 = pnand %p1371_p11, %p1549_p5 }
  0x1e   : > { %v343_v29 = vpack.c.bf16 %v335_v28, %v334_v27  ;;  %v1330_v33 = vld [vmem:[%s1838_s3 + $0x38] sm:$0xff]   ;;  %v1333_v36 = vld [vmem:[%s1838_s3 + $0x20] sm:$0xff]   ;;  %p1379_p2 = por %p1378_p1, %p1377_p0 }
  0x1f   : > { %1216 = vmatpush3.bf16.msra.mxu1 %v1324_v3  ;;  %1243 = vmatprep.subr.bf16.mxu0 %v1330_v33  ;;  %v1334_v37 = vld [vmem:[%s1838_s3 + $0x18] sm:$0xff]   ;;  %v1634_v39 = vld [vmem:[%s1839_s4] ss:$0 sm:$0xff]  ;;  %p1373_p13 = pneg %p1372_p12 }
  0x20   : > { %1217 = vmatprep.subr.bf16.mxu1 %v1325_v13  ;;  %1244 = vmatpush3.bf16.msra.mxu0 %v1330_v33 }
  0x21   : > { %1245 = vmatprep.subr.bf16.mxu0 %v1331_v34  ;;  %p1380_p3 = pnand %p1379_p2, %p1373_p13 }
  0x23   : > { %1218 = vmatpush3.bf16.msra.mxu1 %v1325_v13 }
  0x24   : > { %1219 = vmatprep.subr.bf16.mxu1 %v1326_v18  ;;  %1200 = vmatmul.mubr.msk.bf16.gmra.mxu0 %vm359_vm0, %v339_v19 }
  0x25   : > { %1203 = vmatprep.mubr.msk.bf16.mxu0 %vm359_vm0, %v340_v20  ;;  %1246 = vmatpush3.bf16.msra.mxu0 %v1331_v34 }
  0x26   : > { %1247 = vmatprep.subr.bf16.mxu0 %v1332_v35 }
  0x27   : > { %1220 = vmatpush3.bf16.msra.mxu1 %v1326_v18 }
  0x28   : > { %1221 = vmatprep.subr.bf16.mxu1 %v1327_v30 }
  0x29   : > { %1248 = vmatpush3.bf16.msra.mxu0 %v1332_v35 }
  0x2a   : > { %1249 = vmatprep.subr.bf16.mxu0 %v1333_v36 }
  0x2b   : > { %1222 = vmatpush3.bf16.msra.mxu1 %v1327_v30 }
  0x2c   : > { %1204 = vmatmul.mubr.msk.bf16.gmra.mxu0 %vm359_vm0, %v341_v25  ;;  %1223 = vmatprep.subr.bf16.mxu1 %v1328_v31 }
  0x2d   : > { %1207 = vmatprep.mubr.msk.bf16.mxu0 %vm359_vm0, %v342_v26  ;;  %1250 = vmatpush3.bf16.msra.mxu0 %v1333_v36 }
  0x2e   : > { %1251 = vmatprep.subr.bf16.mxu0 %v1334_v37 }
  0x2f   : > { %1224 = vmatpush3.bf16.msra.mxu1 %v1328_v31 }
  0x30   : > { %1225 = vmatprep.subr.bf16.mxu1 %v1329_v32 }
  0x31   : > { %1252 = vmatpush3.bf16.msra.mxu0 %v1334_v37 }
  0x33   : > { %1226 = vmatpush3.bf16.msra.mxu1 %v1329_v32 }
  0x34   : > { %1208 = vmatmul.mubr.msk.bf16.gmra.mxu0 %vm359_vm0, %v343_v29 }
  0xdc   : > { %v1197_v38 = vpop.f32.mrf.mxu0 }
  0xdd   : > { %v427_v42 = vadd.f32 %v1197_v38, %v1634_v39 }
  0xde   : > { %v418_v40 = vpop.f32.mrf.mxu0 }
  0xdf   : > { %v419_v41 = vadd.f32 %v1634_v39, %v418_v40  ;;  %v499_v49 = vmul.f32 0.01, %v427_v42  ;;  %vm483_vm3 = vcmp.ge.f32.partialorder %v427_v42, 0.0 }
  0xe0   : > { %v1198_v43 = vpop.f32.mrf.mxu0 }
  0xe1   : > { %v430_v44 = vadd.f32 %v1198_v43, %v1634_v39  ;;  %v497_v46 = vmul.f32 0.01, %v419_v41  ;;  %vm481_vm2 = vcmp.ge.f32.partialorder %v419_v41, 0.0  ;;  %v515_v60 = vsel %vm483_vm3, %v427_v42, %v499_v49  ;;  %v1337_v49 = vld [vmem:[%s1838_s3] sm:$0xff]  }
  0xe2   : > { %v421_v45 = vpop.f32.mrf.mxu0 }
  0xe3   : > { %vm484_vm1 = vcmp.ge.f32.partialorder %v430_v44, 0.0  ;;  %v500_v47 = vmul.f32 0.01, %v430_v44  ;;  %v422_v48 = vadd.f32 %v1634_v39, %v421_v45  ;;  %v513_v55 = vsel %vm481_vm2, %v419_v41, %v497_v46 }
  0xe4   : > { %v1201_v50 = vpop.f32.mrf.mxu0 }
  0xe5   : > { %v498_v51 = vmul.f32 0.01, %v422_v48  ;;  %vm482_vm4 = vcmp.ge.f32.partialorder %v422_v48, 0.0  ;;  %v516_v53 = vsel %vm484_vm1, %v430_v44, %v500_v47  ;;  %v443_v57 = vadd.f32 %v1201_v50, %v1634_v39  ;;  %v1667_v50 = vld [vmem:[%s1840_s5] ss:$0 sm:$0xff] }
  0xe6   : > { %v434_v52 = vpop.f32.mrf.mxu0  ;;  %v530_v62 = vpack.c.bf16 %v516_v53, %v515_v60 }
  0xe7   : > { %v435_v54 = vadd.f32 %v1634_v39, %v434_v52  ;;  %v514_v56 = vsel %vm482_vm4, %v422_v48, %v498_v51  ;;  %v503_v3 = vmul.f32 0.01, %v443_v57  ;;  %vm487_vm7 = vcmp.ge.f32.partialorder %v443_v57, 0.0  ;;  %v1335_v48 = vld [vmem:[%s1838_s3 + $0x10] sm:$0xff]  }
  0xe8   : > { %v1202_v58 = vpop.f32.mrf.mxu0  ;;  %v529_v59 = vpack.c.bf16 %v514_v56, %v513_v55  ;;  %1253 = vmatprep.subr.bf16.mxu0 %v1335_v48 }
  0xe9   : > { %v446_v61 = vadd.f32 %v1202_v58, %v1634_v39  ;;  %v501_v0 = vmul.f32 0.01, %v435_v54  ;;  %vm485_vm6 = vcmp.ge.f32.partialorder %v435_v54, 0.0  ;;  %v519_v14 = vsel %vm487_vm7, %v443_v57, %v503_v3  ;;  %1254 = vmatpush3.bf16.msra.mxu0 %v1335_v48 }
  0xea   : > { %v437_v63 = vpop.f32.mrf.mxu0  ;;  %1227 = vmatprep.mubr.bf16.mxu1 %v529_v59 }
  0xeb   : > { %vm488_vm5 = vcmp.ge.f32.partialorder %v446_v61, 0.0  ;;  %v504_v1 = vmul.f32 0.01, %v446_v61  ;;  %v438_v2 = vadd.f32 %v1634_v39, %v437_v63  ;;  %1228 = vmatmul.mubr.bf16.vlgmr.msra.gmra.mxu1 %v530_v62  ;;  %v517_v9 = vsel %vm485_vm6, %v435_v54, %v501_v0 }
  0xec   : > { %v1205_v4 = vpop.f32.mrf.mxu0 }
  0xed   : > { %vm486_vm8 = vcmp.ge.f32.partialorder %v438_v2, 0.0  ;;  %v502_v5 = vmul.f32 0.01, %v438_v2  ;;  %v520_v7 = vsel %vm488_vm5, %v446_v61, %v504_v1  ;;  %v459_v11 = vadd.f32 %v1205_v4, %v1634_v39 }
  0xee   : > { %v450_v6 = vpop.f32.mrf.mxu0  ;;  %v532_v16 = vpack.c.bf16 %v520_v7, %v519_v14 }
  0xef   : > { %v451_v8 = vadd.f32 %v1634_v39, %v450_v6  ;;  %v518_v10 = vsel %vm486_vm8, %v438_v2, %v502_v5  ;;  %v507_v21 = vmul.f32 0.01, %v459_v11  ;;  %vm491_vm11 = vcmp.ge.f32.partialorder %v459_v11, 0.0 }
  0xf0   : > { %v1206_v12 = vpop.f32.mrf.mxu0  ;;  %v531_v13 = vpack.c.bf16 %v518_v10, %v517_v9 }
  0xf1   : > { %v462_v15 = vadd.f32 %v1206_v12, %v1634_v39  ;;  %v505_v18 = vmul.f32 0.01, %v451_v8  ;;  %vm489_vm10 = vcmp.ge.f32.partialorder %v451_v8, 0.0  ;;  %v523_v32 = vsel %vm491_vm11, %v459_v11, %v507_v21 }
  0xf2   : > { %v453_v17 = vpop.f32.mrf.mxu0  ;;  %1231 = vmatprep.mubr.bf16.mxu1 %v531_v13 }
  0xf3   : > { %vm492_vm9 = vcmp.ge.f32.partialorder %v462_v15, 0.0  ;;  %v508_v19 = vmul.f32 0.01, %v462_v15  ;;  %v454_v20 = vadd.f32 %v1634_v39, %v453_v17  ;;  %1232 = vmatmul.mubr.bf16.gmra.mxu1 %v532_v16  ;;  %v521_v27 = vsel %vm489_vm10, %v451_v8, %v505_v18 }
  0xf4   : > { %v1209_v22 = vpop.f32.mrf.mxu0 }
  0xf5   : > { %vm490_vm12 = vcmp.ge.f32.partialorder %v454_v20, 0.0  ;;  %v506_v23 = vmul.f32 0.01, %v454_v20  ;;  %v524_v25 = vsel %vm492_vm9, %v462_v15, %v508_v19  ;;  %v475_v29 = vadd.f32 %v1209_v22, %v1634_v39 }
  0xf6   : > { %v466_v24 = vpop.f32.mrf.mxu0  ;;  %v534_v34 = vpack.c.bf16 %v524_v25, %v523_v32 }
  0xf7   : > { %v467_v26 = vadd.f32 %v1634_v39, %v466_v24  ;;  %v522_v28 = vsel %vm490_vm12, %v454_v20, %v506_v23  ;;  %v511_v40 = vmul.f32 0.01, %v475_v29  ;;  %vm495_vm15 = vcmp.ge.f32.partialorder %v475_v29, 0.0 }
  0xf8   : > { %v1210_v30 = vpop.f32.mrf.mxu0  ;;  %v533_v31 = vpack.c.bf16 %v522_v28, %v521_v27 }
  0xf9   : > { %v478_v33 = vadd.f32 %v1210_v30, %v1634_v39  ;;  %v509_v36 = vmul.f32 0.01, %v467_v26  ;;  %vm493_vm14 = vcmp.ge.f32.partialorder %v467_v26, 0.0  ;;  %v527_v46 = vsel %vm495_vm15, %v475_v29, %v511_v40 }
  0xfa   : > { %v469_v35 = vpop.f32.mrf.mxu0  ;;  %1235 = vmatprep.mubr.bf16.mxu1 %v533_v31 }
  0xfb   : > { %vm496_vm13 = vcmp.ge.f32.partialorder %v478_v33, 0.0  ;;  %v512_v37 = vmul.f32 0.01, %v478_v33  ;;  %v470_v38 = vadd.f32 %v1634_v39, %v469_v35  ;;  %1236 = vmatmul.mubr.bf16.gmra.mxu1 %v534_v34  ;;  %v525_v43 = vsel %vm493_vm14, %v467_v26, %v509_v36  ;;  %v1336_v39 = vld [vmem:[%s1838_s3 + $0x8] sm:$0xff]  }
  0xfc   : > { %1255 = vmatprep.subr.bf16.mxu0 %v1336_v39 }
  0xfd   : > { %vm494_vm0 = vcmp.ge.f32.partialorder %v470_v38, 0.0  ;;  %v510_v41 = vmul.f32 0.01, %v470_v38  ;;  %v528_v42 = vsel %vm496_vm13, %v478_v33, %v512_v37  ;;  %1256 = vmatpush3.bf16.msra.mxu0 %v1336_v39 }
  0xfe   : > { %v536_v47 = vpack.c.bf16 %v528_v42, %v527_v46  ;;  %1257 = vmatprep.subr.bf16.mxu0 %v1337_v49 }
  0xff   : > { %v526_v44 = vsel %vm494_vm0, %v470_v38, %v510_v41 }
 0x100   : > { %v535_v45 = vpack.c.bf16 %v526_v44, %v525_v43 }
 0x101   : > { %1258 = vmatpush3.bf16.msra.mxu0 %v1337_v49 }
 0x102   : > { %1239 = vmatprep.mubr.bf16.mxu1 %v535_v45 }
 0x103   : > { %1240 = vmatmul.mubr.bf16.gmra.mxu1 %v536_v47 }
 0x1ab   : > { %v1229_v51 = vpop.f32.mrf.mxu1 }
 0x1ac   : > { %v651_v52 = vadd.f32 %v1229_v51, %v1667_v50 }
 0x1ad   : > { %v642_v53 = vpop.f32.mrf.mxu1 }
 0x1ae   : > { %vm707_vm1 = vcmp.ge.f32.partialorder %v651_v52, 0.0  ;;  %v723_v54 = vmul.f32 0.01, %v651_v52  ;;  %v643_v55 = vadd.f32 %v1667_v50, %v642_v53 }
 0x1af   : > { %v1230_v56 = vpop.f32.mrf.mxu1 }
 0x1b0   : > { %v739_v57 = vsel %vm707_vm1, %v651_v52, %v723_v54  ;;  %vm705_vm2 = vcmp.ge.f32.partialorder %v643_v55, 0.0  ;;  %v721_v58 = vmul.f32 0.01, %v643_v55  ;;  %v654_v59 = vadd.f32 %v1230_v56, %v1667_v50 }
 0x1b1   : > { %755 = vst [vmem:[%s1675_s23 + $0x10] sm:$0xff] %v739_v57  ;;  %v645_v60 = vpop.f32.mrf.mxu1 }
 0x1b2   : > { %vm708_vm3 = vcmp.ge.f32.partialorder %v654_v59, 0.0  ;;  %v724_v61 = vmul.f32 0.01, %v654_v59  ;;  %v646_v62 = vadd.f32 %v1667_v50, %v645_v60  ;;  %v737_v63 = vsel %vm705_vm2, %v643_v55, %v721_v58 }
 0x1b3   : > { %v1233_v0 = vpop.f32.mrf.mxu1  ;;  %753 = vst [vmem:[%s1675_s23] sm:$0xff] %v737_v63 }
 0x1b4   : > { %v740_v1 = vsel %vm708_vm3, %v654_v59, %v724_v61  ;;  %vm706_vm4 = vcmp.ge.f32.partialorder %v646_v62, 0.0  ;;  %v722_v2 = vmul.f32 0.01, %v646_v62  ;;  %v667_v3 = vadd.f32 %v1233_v0, %v1667_v50 }
 0x1b5   : > { %756 = vst [vmem:[%s1675_s23 + $0x18] sm:$0xff] %v740_v1  ;;  %v658_v4 = vpop.f32.mrf.mxu1  ;;  %v770_v8 = vpack.c.bf16 %v740_v1, %v739_v57 }
 0x1b6   : > { %vm711_vm5 = vcmp.ge.f32.partialorder %v667_v3, 0.0  ;;  %v727_v5 = vmul.f32 0.01, %v667_v3  ;;  %v659_v6 = vadd.f32 %v1667_v50, %v658_v4  ;;  %v738_v7 = vsel %vm706_vm4, %v646_v62, %v722_v2 }
 0x1b7   : > { %v1234_v9 = vpop.f32.mrf.mxu1  ;;  %754 = vst [vmem:[%s1675_s23 + $0x8] sm:$0xff] %v738_v7  ;;  %v769_v10 = vpack.c.bf16 %v738_v7, %v737_v63 }
 0x1b8   : > { %vm709_vm6 = vcmp.ge.f32.partialorder %v659_v6, 0.0  ;;  %v725_v11 = vmul.f32 0.01, %v659_v6  ;;  %v670_v12 = vadd.f32 %v1234_v9, %v1667_v50  ;;  %v743_v13 = vsel %vm711_vm5, %v667_v3, %v727_v5 }
 0x1b9   : > { %v661_v14 = vpop.f32.mrf.mxu1  ;;  %1259 = vmatprep.mubr.bf16.mxu0 %v769_v10  ;;  %759 = vst [vmem:[%s1675_s23 + $0x30] sm:$0xff] %v743_v13 }
 0x1ba   : > { %vm712_vm7 = vcmp.ge.f32.partialorder %v670_v12, 0.0  ;;  %v728_v15 = vmul.f32 0.01, %v670_v12  ;;  %v662_v16 = vadd.f32 %v1667_v50, %v661_v14  ;;  %1260 = vmatmul.mubr.bf16.vlgmr.msra.gmra.mxu0 %v770_v8  ;;  %v741_v17 = vsel %vm709_vm6, %v659_v6, %v725_v11 }
 0x1bb   : > { %v1237_v18 = vpop.f32.mrf.mxu1  ;;  %757 = vst [vmem:[%s1675_s23 + $0x20] sm:$0xff] %v741_v17 }
 0x1bc   : > { %vm710_vm8 = vcmp.ge.f32.partialorder %v662_v16, 0.0  ;;  %v726_v19 = vmul.f32 0.01, %v662_v16  ;;  %v683_v20 = vadd.f32 %v1237_v18, %v1667_v50  ;;  %v744_v21 = vsel %vm712_vm7, %v670_v12, %v728_v15 }
 0x1bd   : > { %v674_v22 = vpop.f32.mrf.mxu1  ;;  %760 = vst [vmem:[%s1675_s23 + $0x38] sm:$0xff] %v744_v21  ;;  %v772_v28 = vpack.c.bf16 %v744_v21, %v743_v13 }
 0x1be   : > { %vm715_vm9 = vcmp.ge.f32.partialorder %v683_v20, 0.0  ;;  %v731_v23 = vmul.f32 0.01, %v683_v20  ;;  %v675_v24 = vadd.f32 %v1667_v50, %v674_v22  ;;  %v742_v25 = vsel %vm710_vm8, %v662_v16, %v726_v19 }
 0x1bf   : > { %v1238_v26 = vpop.f32.mrf.mxu1  ;;  %758 = vst [vmem:[%s1675_s23 + $0x28] sm:$0xff] %v742_v25  ;;  %v771_v27 = vpack.c.bf16 %v742_v25, %v741_v17 }
 0x1c0   : > { %vm713_vm10 = vcmp.ge.f32.partialorder %v675_v24, 0.0  ;;  %v729_v29 = vmul.f32 0.01, %v675_v24  ;;  %v686_v30 = vadd.f32 %v1238_v26, %v1667_v50  ;;  %v747_v31 = vsel %vm715_vm9, %v683_v20, %v731_v23 }
 0x1c1   : > { %v677_v32 = vpop.f32.mrf.mxu1  ;;  %1263 = vmatprep.mubr.bf16.mxu0 %v771_v27  ;;  %763 = vst [vmem:[%s1675_s23 + $0x50] sm:$0xff] %v747_v31 }
 0x1c2   : > { %vm716_vm11 = vcmp.ge.f32.partialorder %v686_v30, 0.0  ;;  %v732_v33 = vmul.f32 0.01, %v686_v30  ;;  %v678_v34 = vadd.f32 %v1667_v50, %v677_v32  ;;  %1264 = vmatmul.mubr.bf16.gmra.mxu0 %v772_v28  ;;  %v745_v35 = vsel %vm713_vm10, %v675_v24, %v729_v29 }
 0x1c3   : > { %v1241_v36 = vpop.f32.mrf.mxu1  ;;  %761 = vst [vmem:[%s1675_s23 + $0x40] sm:$0xff] %v745_v35 }
 0x1c4   : > { %vm714_vm12 = vcmp.ge.f32.partialorder %v678_v34, 0.0  ;;  %v730_v37 = vmul.f32 0.01, %v678_v34  ;;  %v699_v38 = vadd.f32 %v1241_v36, %v1667_v50  ;;  %v748_v40 = vsel %vm716_vm11, %v686_v30, %v732_v33 }
 0x1c5   : > { %v690_v41 = vpop.f32.mrf.mxu1  ;;  %764 = vst [vmem:[%s1675_s23 + $0x58] sm:$0xff] %v748_v40  ;;  %v774_v47 = vpack.c.bf16 %v748_v40, %v747_v31 }
 0x1c6   : > { %vm719_vm13 = vcmp.ge.f32.partialorder %v699_v38, 0.0  ;;  %v735_v42 = vmul.f32 0.01, %v699_v38  ;;  %v691_v43 = vadd.f32 %v1667_v50, %v690_v41  ;;  %v746_v44 = vsel %vm714_vm12, %v678_v34, %v730_v37 }
 0x1c7   : > { %v1242_v45 = vpop.f32.mrf.mxu1  ;;  %762 = vst [vmem:[%s1675_s23 + $0x48] sm:$0xff] %v746_v44  ;;  %v773_v46 = vpack.c.bf16 %v746_v44, %v745_v35 }
 0x1c8   : > { %vm717_vm14 = vcmp.ge.f32.partialorder %v691_v43, 0.0  ;;  %v733_v48 = vmul.f32 0.01, %v691_v43  ;;  %v702_v39 = vadd.f32 %v1242_v45, %v1667_v50  ;;  %v751_v49 = vsel %vm719_vm13, %v699_v38, %v735_v42 }
 0x1c9   : > { %v693_v51 = vpop.f32.mrf.mxu1  ;;  %1267 = vmatprep.mubr.bf16.mxu0 %v773_v46  ;;  %767 = vst [vmem:[%s1675_s23 + $0x70] sm:$0xff] %v751_v49 }
 0x1ca   : > { %vm720_vm15 = vcmp.ge.f32.partialorder %v702_v39, 0.0  ;;  %v736_v52 = vmul.f32 0.01, %v702_v39  ;;  %v694_v53 = vadd.f32 %v1667_v50, %v693_v51  ;;  %1268 = vmatmul.mubr.bf16.gmra.mxu0 %v774_v47  ;;  %v749_v54 = vsel %vm717_vm14, %v691_v43, %v733_v48 }
 0x1cb   : > { %765 = vst [vmem:[%s1675_s23 + $0x60] sm:$0xff] %v749_v54 }
 0x1cc   : > { %vm718_vm0 = vcmp.ge.f32.partialorder %v694_v53, 0.0  ;;  %v734_v55 = vmul.f32 0.01, %v694_v53  ;;  %v752_v56 = vsel %vm720_vm15, %v702_v39, %v736_v52 }
 0x1cd   : > { %768 = vst [vmem:[%s1675_s23 + $0x78] sm:$0xff] %v752_v56  ;;  %v776_v59 = vpack.c.bf16 %v752_v56, %v751_v49 }
 0x1ce   : > { %v750_v57 = vsel %vm718_vm0, %v694_v53, %v734_v55 }
 0x1cf   : > { %766 = vst [vmem:[%s1675_s23 + $0x68] sm:$0xff] %v750_v57  ;;  %v775_v58 = vpack.c.bf16 %v750_v57, %v749_v54 }
 0x1d1   : > { %1271 = vmatprep.mubr.bf16.mxu0 %v775_v58 }
 0x1d2   : > { %1272 = vmatmul.mubr.bf16.gmra.mxu0 %v776_v59 }
 0x1d3   : > { %1383 = shalt.err (!%p1380_p3)
}
 0x1d4   : > { %s1384_s23 = scalar_lea.hbm %s1712_s10, 2048  ;;  %s1388_s18 = scalar_lea.hbm %s1843_s8, 4096 }
 0x1d5   : > { %p1385_p4 = scmp.ne.s32.totalorder %s1712_s10, %s1384_s23  ;;  %p1389_p9 = scmp.lt.s32.totalorder %s1712_s10, %s1843_s8 }
 0x1d6   : > { %p1390_p10 = scmp.lt.s32.totalorder %s1388_s18, %s1384_s23 }
 0x1d7   : > { %p1386_p7 = pnand %p1385_p4, %p1549_p5 }
 0x1d8   : > { %p1391_p11 = por %p1390_p10, %p1389_p9 }
 0x1d9   : > { %p1387_p8 = pneg %p1386_p7 }
 0x1db   : > { %p1392_p12 = pnand %p1391_p11, %p1387_p8 }
 0x1dd   : > { %1395 = shalt.err (!%p1392_p12)
}
 0x1de   : > { %s1463_s17 = smov 128   ;;  %s1464_s20 = smov 8   ;;  %v1746_v50 = vld [vmem:[%s1841_s6] ss:$0 sm:$0xff] }
 0x1df   : > { %1276 = dma.vmem_to_hbm [thread:$0]  (%p1549_p5), %s1715_s12, 2048, %s1712_s10, %s983_s13, %s1463_s17, %s1463_s17, %s1464_s20  }
 0x1e0   : > { %s1848_s22 = sshll.u32 %s1662_s19, 7  ;;  %s1849_s12 = sshll.u32 %s1532_s9, 11 }
 0x1e1   : > { %s1758_s24 = scalar_lea.vmem [#allocation2], %s1848_s22  ;;  %s1789_s26 = scalar_lea.hbm %s1842_s7, %s1849_s12 }
 0x1e2   : > { %s996_s10 = sshll.u32 %s1758_s24, 4  ;;  %s978_s18 = scalar_lea.sflag [#allocation3], %s1662_s19  ;;  %s1791_s10 = int_to_ptr.vmem [resolvable:$true] %s996_s10 }
 0x1e3   : > { %s1396_s21 = scalar_lea.vmem %s1791_s10, 2048  ;;  %s1465_s25 = smov [#allocation2]  }
 0x1e4   : > { %p1397_p13 = scmp.ne.s32.totalorder %s1791_s10, %s1396_s21  ;;  %s1400_s9 = sshll.u32 %s1465_s25, 4  ;;  %s1401_s9 = int_to_ptr.vmem [resolvable:$false] %s1400_s9 }
 0x1e5   : > { %s1402_s22 = scalar_lea.vmem %s1401_s9, 4096  ;;  %p1403_p2 = scmp.lt.s32.totalorder %s1791_s10, %s1401_s9 }
 0x1e6   : > { %p1398_p0 = pnand %p1397_p13, %p1549_p5  ;;  %p1404_p3 = scmp.lt.s32.totalorder %s1402_s22, %s1396_s21 }
 0x1e8   : > { %p1399_p1 = pneg %p1398_p0  ;;  %p1405_p4 = por %p1404_p3, %p1403_p2 }
 0x1ea   : > { %p1406_p7 = pnand %p1405_p4, %p1399_p1 }
 0x27a   : > { %v1261_v60 = vpop.f32.mrf.mxu0 }
 0x27b   : > { %v891_v61 = vadd.f32 %v1261_v60, %v1746_v50 }
 0x27c   : > { %v882_v62 = vpop.f32.mrf.mxu0 }
 0x27d   : > { %1338 = vtanh.f32 %v891_v61  ;;  %v883_v63 = vadd.f32 %v1746_v50, %v882_v62 }
 0x27e   : > { %v1262_v0 = vpop.f32.mrf.mxu0 }
 0x27f   : > { %1340 = vtanh.f32 %v883_v63  ;;  %v894_v1 = vadd.f32 %v1262_v0, %v1746_v50 }
 0x280   : > { %v885_v2 = vpop.f32.mrf.mxu0 }
 0x281   : > { %1342 = vtanh.f32 %v894_v1  ;;  %v886_v3 = vadd.f32 %v1746_v50, %v885_v2 }
 0x282   : > { %v1265_v4 = vpop.f32.mrf.mxu0 }
 0x283   : > { %1344 = vtanh.f32 %v886_v3  ;;  %v907_v5 = vadd.f32 %v1265_v4, %v1746_v50 }
 0x284   : > { %v898_v6 = vpop.f32.mrf.mxu0 }
 0x285   : > { %1346 = vtanh.f32 %v907_v5  ;;  %v899_v7 = vadd.f32 %v1746_v50, %v898_v6 }
 0x286   : > { %v1266_v8 = vpop.f32.mrf.mxu0 }
 0x287   : > { %1348 = vtanh.f32 %v899_v7  ;;  %v910_v9 = vadd.f32 %v1266_v8, %v1746_v50 }
 0x288   : > { %v901_v10 = vpop.f32.mrf.mxu0 }
 0x289   : > { %1350 = vtanh.f32 %v910_v9  ;;  %v902_v11 = vadd.f32 %v1746_v50, %v901_v10 }
 0x28a   : > { %v1339_v12 = vpop.eup %1338  ;;  %v1269_v13 = vpop.f32.mrf.mxu0 }
 0x28b   : > { %963 = vst [vmem:[%s1758_s24 + $0x10] sm:$0xff] %v1339_v12  ;;  %1352 = vtanh.f32 %v902_v11  ;;  %v923_v14 = vadd.f32 %v1269_v13, %v1746_v50 }
 0x28c   : > { %v1341_v15 = vpop.eup %1340  ;;  %v914_v16 = vpop.f32.mrf.mxu0 }
 0x28d   : > { %961 = vst [vmem:[%s1758_s24] sm:$0xff] %v1341_v15  ;;  %1354 = vtanh.f32 %v923_v14  ;;  %v915_v17 = vadd.f32 %v1746_v50, %v914_v16 }
 0x28e   : > { %v1343_v18 = vpop.eup %1342  ;;  %v1270_v19 = vpop.f32.mrf.mxu0 }
 0x28f   : > { %964 = vst [vmem:[%s1758_s24 + $0x18] sm:$0xff] %v1343_v18  ;;  %1356 = vtanh.f32 %v915_v17  ;;  %v926_v20 = vadd.f32 %v1270_v19, %v1746_v50 }
 0x290   : > { %v1345_v21 = vpop.eup %1344  ;;  %v917_v22 = vpop.f32.mrf.mxu0 }
 0x291   : > { %962 = vst [vmem:[%s1758_s24 + $0x8] sm:$0xff] %v1345_v21  ;;  %1358 = vtanh.f32 %v926_v20  ;;  %v918_v23 = vadd.f32 %v1746_v50, %v917_v22 }
 0x292   : > { %v1347_v24 = vpop.eup %1346  ;;  %v1273_v25 = vpop.f32.mrf.mxu0 }
 0x293   : > { %967 = vst [vmem:[%s1758_s24 + $0x30] sm:$0xff] %v1347_v24  ;;  %1360 = vtanh.f32 %v918_v23  ;;  %v939_v26 = vadd.f32 %v1273_v25, %v1746_v50 }
 0x294   : > { %v1349_v27 = vpop.eup %1348  ;;  %v930_v28 = vpop.f32.mrf.mxu0 }
 0x295   : > { %965 = vst [vmem:[%s1758_s24 + $0x20] sm:$0xff] %v1349_v27  ;;  %1362 = vtanh.f32 %v939_v26  ;;  %v931_v29 = vadd.f32 %v1746_v50, %v930_v28 }
 0x296   : > { %v1351_v30 = vpop.eup %1350  ;;  %v1274_v31 = vpop.f32.mrf.mxu0 }
 0x297   : > { %968 = vst [vmem:[%s1758_s24 + $0x38] sm:$0xff] %v1351_v30  ;;  %1364 = vtanh.f32 %v931_v29  ;;  %v942_v32 = vadd.f32 %v1274_v31, %v1746_v50 }
 0x298   : > { %v1353_v33 = vpop.eup %1352  ;;  %v933_v34 = vpop.f32.mrf.mxu0 }
 0x299   : > { %966 = vst [vmem:[%s1758_s24 + $0x28] sm:$0xff] %v1353_v33  ;;  %1366 = vtanh.f32 %v942_v32  ;;  %v934_v35 = vadd.f32 %v1746_v50, %v933_v34 }
 0x29a   : > { %v1355_v36 = vpop.eup %1354 }
 0x29b   : > { %971 = vst [vmem:[%s1758_s24 + $0x50] sm:$0xff] %v1355_v36  ;;  %1368 = vtanh.f32 %v934_v35 }
 0x29c   : > { %v1357_v37 = vpop.eup %1356 }
 0x29d   : > { %969 = vst [vmem:[%s1758_s24 + $0x40] sm:$0xff] %v1357_v37 }
 0x29e   : > { %v1359_v38 = vpop.eup %1358 }
 0x29f   : > { %972 = vst [vmem:[%s1758_s24 + $0x58] sm:$0xff] %v1359_v38 }
 0x2a0   : > { %v1361_v40 = vpop.eup %1360 }
 0x2a1   : > { %970 = vst [vmem:[%s1758_s24 + $0x48] sm:$0xff] %v1361_v40 }
 0x2a2   : > { %v1363_v41 = vpop.eup %1362 }
 0x2a3   : > { %975 = vst [vmem:[%s1758_s24 + $0x70] sm:$0xff] %v1363_v41 }
 0x2a4   : > { %v1365_v42 = vpop.eup %1364 }
 0x2a5   : > { %973 = vst [vmem:[%s1758_s24 + $0x60] sm:$0xff] %v1365_v42 }
 0x2a6   : > { %v1367_v43 = vpop.eup %1366 }
 0x2a7   : > { %976 = vst [vmem:[%s1758_s24 + $0x78] sm:$0xff] %v1367_v43 }
 0x2a8   : > { %v1369_v44 = vpop.eup %1368 }
 0x2a9   : > { %974 = vst [vmem:[%s1758_s24 + $0x68] sm:$0xff] %v1369_v44 }
 0x2aa   : > { %1409 = shalt.err (!%p1406_p7)
}
 0x2ab   : > { %s1410_s24 = scalar_lea.hbm %s1789_s26, 2048  ;;  %s1414_s13 = scalar_lea.hbm %s1842_s7, 4096 }
 0x2ac   : > { %p1411_p8 = scmp.ne.s32.totalorder %s1789_s26, %s1410_s24  ;;  %p1415_p11 = scmp.lt.s32.totalorder %s1789_s26, %s1842_s7 }
 0x2ad   : > { %p1416_p12 = scmp.lt.s32.totalorder %s1414_s13, %s1410_s24 }
 0x2ae   : > { %p1412_p9 = pnand %p1411_p8, %p1549_p5 }
 0x2af   : > { %p1417_p13 = por %p1416_p12, %p1415_p11 }
 0x2b0   : > { %p1413_p10 = pneg %p1412_p9 }
 0x2b2   : > { %p1418_p0 = pnand %p1417_p13, %p1413_p10 }
 0x2b4   : > { %1421 = shalt.err (!%p1418_p0)
}
 0x2b5   : > { %1275 = dma.vmem_to_hbm [thread:$0]  (%p1549_p5), %s1791_s10, 2048, %s1789_s26, %s978_s18, %s1463_s17, %s1463_s17, %s1464_s20  }
 0x2b6 PF: > { %p1286_p1 = scmp.ge.s32.totalorder %s1460_s30, 2  ;;  %s1027_s21 = sand.u32 1, %s1448_s27  }
 0x2b7   : > { %s1028_s9 = scalar_lea.sflag [#allocation3], %s1027_s21 }
 0x2b8   : > { %p1280_p2 = pnand %p1286_p1, %p1553_p6 }
 0x2ba   : > { %p1281_p3 = pneg %p1280_p2 }
 0x2bc   : > { %1439 = dma.done.wait (%p1281_p3), %s1028_s9, 2048  }
 0x2bd   : > { %1441 = vsyncadd (%p1281_p3), %s1028_s9, 4294965248  ;;  %s1037_s22 = scalar_lea.sflag [#allocation5], %s1027_s21 }
 0x2be   : > { %1443 = dma.done.wait (%p1281_p3), %s1037_s22, 2048  }
 0x2bf   : > { %1445 = vsyncadd (%p1281_p3), %s1037_s22, 4294965248  ;;  %p22_p5 = scmp.ge.s32.totalorder %s1536_s11, 4   ;;  %s1850_s27 = smov %s1452_s28 }
 0x2c0   : > { %s1851_s28 = smov %s1456_s29  ;;  %s1852_s29 = smov %s1547_s14 }
 0x2c1   : > { %s1853_s30 = smov %s1536_s11  ;;  %24 = sbr.rel (!%p22_p5) target bundleno = 5 (0x5), region = 100 }
 0x2c6   :  { %1042 = vsyncpa [#allocation3], 1 }
 0x2c7   :  { %1044 = vsyncpa [#allocation3 + $0x1], 1 }
 0x2c8   :  { %1045 = vsyncpa [#allocation5], 1 }
 0x2c9   :  { %1047 = vsyncpa [#allocation5 + $0x1], 1 }

</bundles_post_ra>
